<compile_context>
chip_gen: v7x
topology: tpu7x:2x2x1
jax: 0.10.0
libtpu: 0.0.40
codegen_flags: <defaults>
</compile_context>

<pallas_src>
import jax
import jax.numpy as jnp
from jax import lax
from jax.experimental import pallas as pl
from jax.experimental.pallas import tpu as pltpu

_LANE = 128
_SUBLANE = 8


def _round_up(x, m):
    return ((x + m - 1) // m) * m


def _lstm_classifier_kernel(emb_ref, wih_ref, whh_ref, bias_ref,
                            wout_ref, bout_ref, out_ref, pre_sc):
    # emb_ref : (T*Bp, E)  time-major, batch-minor embedded sequence
    # wih_ref : (E, 4H)    W_ih^T, gates packed at natural offsets (i,f,g,o)
    # whh_ref : (H, 4H)    W_hh^T
    # bias_ref: (1, 4H)    b_ih + b_hh
    # wout_ref: (H, Cp)    classifier weight^T (zero-padded lanes)
    # bout_ref: (1, Cp)
    # out_ref : (Bp, Cp)   lane-dense logits
    # pre_sc  : (T*Bp, 4H) input projection (+bias) for ALL timesteps
    TB = emb_ref.shape[0]
    Bp = out_ref.shape[0]
    T = TB // Bp
    H = whh_ref.shape[0]

    # Prologue: the x-contribution has no serial dependency -> one large,
    # MXU-friendly matmul over all timesteps, bias folded in.
    pre_sc[...] = (jnp.dot(emb_ref[...], wih_ref[...],
                           preferred_element_type=jnp.float32)
                   + bias_ref[...])

    # Loop-invariant recurrent weight, held as a value across the unrolled loop.
    w_hh = whh_ref[...]

    def step(t, carry):
        h, c = carry
        row = pl.multiple_of(t * Bp, Bp)
        gates = pre_sc[pl.ds(row, Bp), :] + jnp.dot(
            h, w_hh, preferred_element_type=jnp.float32)
        # PyTorch gate order: i, f, g, o (natural offsets, width H each).
        i_g = jax.nn.sigmoid(gates[:, 0 * H:1 * H])
        f_g = jax.nn.sigmoid(gates[:, 1 * H:2 * H])
        g_g = jnp.tanh(gates[:, 2 * H:3 * H])
        o_g = jax.nn.sigmoid(gates[:, 3 * H:4 * H])
        c_new = f_g * c + i_g * g_g
        h_new = o_g * jnp.tanh(c_new)
        return (h_new, c_new)

    h0 = jnp.zeros((Bp, H), jnp.float32)
    c0 = jnp.zeros((Bp, H), jnp.float32)
    h_last, _ = lax.fori_loop(0, T, step, (h0, c0), unroll=True)

    # Classifier on the last hidden state; lane-dense padded output store.
    logits = (jnp.dot(h_last, wout_ref[...],
                      preferred_element_type=jnp.float32)
              + bout_ref[...])
    out_ref[...] = logits.astype(out_ref.dtype)


def model_forward(tokens, emb_table, w_ih, w_hh, b_ih, b_hh, w_out, b_out):
    """tokens: (T, B) int32. Returns logits (B, nclasses) float32."""
    T, B = tokens.shape
    E = emb_table.shape[1]
    H = w_hh.shape[1]
    H4 = 4 * H
    nclasses = w_out.shape[0]

    Bp = _round_up(max(B, _SUBLANE), _SUBLANE)
    Cp = _round_up(nclasses, _LANE)

    # Pad only the batch dim (padded rows see token 0; per-row LSTM math is
    # independent, so their garbage never touches real rows and is sliced off)
    # and gather directly into the padded layout -> no extra full-sequence
    # pad/copy of the embedded sequence in HBM.
    tokens_p = jnp.zeros((T, Bp), tokens.dtype).at[:, :B].set(tokens)
    emb2d = jnp.take(emb_table, tokens_p, axis=0).reshape(T * Bp, E)
    emb2d = emb2d.astype(jnp.float32)

    # Pre-transposed weights; gates packed at natural offsets (i, f, g, o).
    w_ih_t = jnp.asarray(w_ih, jnp.float32).T                       # (E, 4H)
    w_hh_t = jnp.asarray(w_hh, jnp.float32).T                       # (H, 4H)
    bias = (b_ih + b_hh).astype(jnp.float32).reshape(1, H4)

    # Classifier weight/bias zero-padded to a lane-dense output width.
    w_out_p = jnp.zeros((H, Cp), jnp.float32).at[:, :nclasses].set(
        jnp.asarray(w_out, jnp.float32).T)
    b_out_p = jnp.zeros((1, Cp), jnp.float32).at[0, :nclasses].set(
        jnp.asarray(b_out, jnp.float32))

    out_p = pl.pallas_call(
        _lstm_classifier_kernel,
        out_shape=jax.ShapeDtypeStruct((Bp, Cp), jnp.float32),
        grid_spec=pltpu.PrefetchScalarGridSpec(
            num_scalar_prefetch=0,
            grid=(1,),
            in_specs=[
                pl.BlockSpec((T * Bp, E), lambda i: (0, 0)),   # emb sequence
                pl.BlockSpec((E, H4), lambda i: (0, 0)),       # W_ih^T
                pl.BlockSpec((H, H4), lambda i: (0, 0)),       # W_hh^T
                pl.BlockSpec((1, H4), lambda i: (0, 0)),       # fused bias
                pl.BlockSpec((H, Cp), lambda i: (0, 0)),       # W_out^T
                pl.BlockSpec((1, Cp), lambda i: (0, 0)),       # b_out
            ],
            out_specs=pl.BlockSpec((Bp, Cp), lambda i: (0, 0)),
            scratch_shapes=[
                pltpu.VMEM((T * Bp, H4), jnp.float32),         # pre-gates
            ],
        ),
        compiler_params=pltpu.CompilerParams(
            dimension_semantics=("arbitrary",)),
    )(emb2d, w_ih_t, w_hh_t, bias, w_out_p, b_out_p)

    return out_p[:B, :nclasses]


def reference_forward(tokens, emb_table, w_ih, w_hh, b_ih, b_hh, w_out, b_out):
    """Pure-JAX reference of the same forward pass."""
    emb = jnp.take(emb_table, tokens, axis=0)                       # (T, B, E)
    B = tokens.shape[1]
    H = w_hh.shape[1]

    def step(carry, x):
        h, c = carry
        gates = x @ w_ih.T + b_ih + h @ w_hh.T + b_hh
        i_g, f_g, g_g, o_g = jnp.split(gates, 4, axis=-1)
        i_g = jax.nn.sigmoid(i_g)
        f_g = jax.nn.sigmoid(f_g)
        g_g = jnp.tanh(g_g)
        o_g = jax.nn.sigmoid(o_g)
        c = f_g * c + i_g * g_g
        h = o_g * jnp.tanh(c)
        return (h, c), None

    (h, _), _ = lax.scan(step,
                         (jnp.zeros((B, H), jnp.float32),
                          jnp.zeros((B, H), jnp.float32)),
                         emb)
    return h @ w_out.T + b_out


if __name__ == "__main__":
    # Small shapes implied by the module: seq length T, batch B, emb size E,
    # hidden d_out H, nclasses=2.
    T, B, VOCAB, E, H, NCLASSES = 8, 4, 32, 32, 32, 2

    key = jax.random.PRNGKey(0)
    ks = jax.random.split(key, 8)
    tokens = jax.random.randint(ks[0], (T, B), 0, VOCAB)       # (length, batch)
    emb_table = jax.random.normal(ks[1], (VOCAB, E), jnp.float32) * 0.1
    w_ih = jax.random.normal(ks[2], (4 * H, E), jnp.float32) * 0.1
    w_hh = jax.random.normal(ks[3], (4 * H, H), jnp.float32) * 0.1
    b_ih = jax.random.normal(ks[4], (4 * H,), jnp.float32) * 0.1
    b_hh = jax.random.normal(ks[5], (4 * H,), jnp.float32) * 0.1
    w_out = jax.random.normal(ks[6], (NCLASSES, H), jnp.float32) * 0.1
    b_out = jax.random.normal(ks[7], (NCLASSES,), jnp.float32) * 0.1

    logits = model_forward(tokens, emb_table, w_ih, w_hh, b_ih, b_hh,
                           w_out, b_out)
    logits = jax.block_until_ready(logits)

    ref = reference_forward(tokens, emb_table, w_ih, w_hh, b_ih, b_hh,
                            w_out, b_out)
    assert logits.shape == (B, NCLASSES)
    assert jnp.allclose(logits, ref, atol=1e-4, rtol=1e-4), (logits, ref)

    print("KERNEL_OK")
</pallas_src>

<mosaic_0001>
module attributes {stable_mosaic.version = 11 : i64} {
  func.func @_lstm_classifier_kernel(%arg0: i32, %arg1: memref<64x32xf32, #tpu.memory_space<vmem>>, %arg2: memref<32x128xf32, #tpu.memory_space<vmem>>, %arg3: memref<32x128xf32, #tpu.memory_space<vmem>>, %arg4: memref<1x128xf32, #tpu.memory_space<vmem>>, %arg5: memref<32x128xf32, #tpu.memory_space<vmem>>, %arg6: memref<1x128xf32, #tpu.memory_space<vmem>>, %arg7: memref<8x128xf32, #tpu.memory_space<vmem>>, %arg8: memref<64x128xf32, #tpu.memory_space<vmem>>) attributes {dimension_semantics = [#tpu.dimension_semantics<arbitrary>], iteration_bounds = array<i64: 1>, scalar_prefetch = 0 : i64, scratch_operands = 1 : i64, tpu.core_type = #tpu.core_type<tc>, window_params = [{pipeline_mode = #tpu.pipeline_mode<synchronous>, transform_indices = @transform_0, window_bounds = array<i64: 64, 32>}, {pipeline_mode = #tpu.pipeline_mode<synchronous>, transform_indices = @transform_1, window_bounds = array<i64: 32, 128>}, {pipeline_mode = #tpu.pipeline_mode<synchronous>, transform_indices = @transform_2, window_bounds = array<i64: 32, 128>}, {pipeline_mode = #tpu.pipeline_mode<synchronous>, transform_indices = @transform_3, window_bounds = array<i64: 1, 128>}, {pipeline_mode = #tpu.pipeline_mode<synchronous>, transform_indices = @transform_4, window_bounds = array<i64: 32, 128>}, {pipeline_mode = #tpu.pipeline_mode<synchronous>, transform_indices = @transform_5, window_bounds = array<i64: 1, 128>}, {pipeline_mode = #tpu.pipeline_mode<synchronous>, transform_indices = @transform_6, window_bounds = array<i64: 8, 128>}]} {
    %c0 = arith.constant 0 : index
    %c0_0 = arith.constant 0 : index
    %0 = vector.load %arg1[%c0, %c0_0] : memref<64x32xf32, #tpu.memory_space<vmem>>, vector<64x32xf32>
    %c0_1 = arith.constant 0 : index
    %c0_2 = arith.constant 0 : index
    %1 = vector.load %arg2[%c0_1, %c0_2] : memref<32x128xf32, #tpu.memory_space<vmem>>, vector<32x128xf32>
    %cst = arith.constant dense<0.000000e+00> : vector<64x128xf32>
    %2 = tpu.matmul %0, %1, %cst {dimension_numbers = #tpu.dot_dimension_numbers<[1], [0], [0], [1], [0, 0, 1, 1], [], []>} : vector<64x32xf32>, vector<32x128xf32>, vector<64x128xf32> -> vector<64x128xf32>
    %c0_3 = arith.constant 0 : index
    %c0_4 = arith.constant 0 : index
    %3 = vector.load %arg4[%c0_3, %c0_4] : memref<1x128xf32, #tpu.memory_space<vmem>>, vector<1x128xf32>
    %4 = vector.broadcast %3 : vector<1x128xf32> to vector<64x128xf32>
    %5 = arith.addf %2, %4 : vector<64x128xf32>
    %c0_5 = arith.constant 0 : index
    %c0_6 = arith.constant 0 : index
    %6 = vector.load %arg8[%c0_5, %c0_6] : memref<64x128xf32, #tpu.memory_space<vmem>>, vector<64x128xf32>
    tpu.vector_store %arg8[%c0_5, %c0_6], %5 {strides = array<i32>} : memref<64x128xf32, #tpu.memory_space<vmem>>, vector<64x128xf32>,
    %c0_7 = arith.constant 0 : index
    %c0_8 = arith.constant 0 : index
    %7 = vector.load %arg3[%c0_7, %c0_8] : memref<32x128xf32, #tpu.memory_space<vmem>>, vector<32x128xf32>
    %cst_9 = arith.constant 0.000000e+00 : f32
    %8 = vector.broadcast %cst_9 : f32 to vector<8x32xf32>
    %cst_10 = arith.constant 0.000000e+00 : f32
    %9 = vector.broadcast %cst_10 : f32 to vector<8x32xf32>
    %c0_i32 = arith.constant 0 : i32
    %c8_i32 = arith.constant 8 : i32
    %10 = arith.muli %c0_i32, %c8_i32 : i32
    %11 = tpu.assume_multiple %10, 8 : i32
    %12 = arith.index_cast %11 : i32 to index
    %c0_11 = arith.constant 0 : index
    %13 = vector.load %arg8[%12, %c0_11] : memref<64x128xf32, #tpu.memory_space<vmem>>, vector<8x128xf32>
    %cst_12 = arith.constant dense<0.000000e+00> : vector<8x128xf32>
    %14 = tpu.matmul %8, %7, %cst_12 {dimension_numbers = #tpu.dot_dimension_numbers<[1], [0], [0], [1], [0, 0, 1, 1], [], []>} : vector<8x32xf32>, vector<32x128xf32>, vector<8x128xf32> -> vector<8x128xf32>
    %15 = arith.addf %13, %14 : vector<8x128xf32>
    %16 = vector.extract_strided_slice %15 {offsets = [0, 0], sizes = [8, 32], strides = [1, 1]} : vector<8x128xf32> to vector<8x32xf32>
    %17 = arith.negf %16 : vector<8x32xf32>
    %18 = math.exp %17 : vector<8x32xf32>
    %cst_13 = arith.constant 1.000000e+00 : f32
    %19 = vector.broadcast %cst_13 : f32 to vector<8x32xf32>
    %20 = arith.addf %19, %18 : vector<8x32xf32>
    %21 = arith.divf %19, %20 : vector<8x32xf32>
    %22 = vector.extract_strided_slice %15 {offsets = [0, 32], sizes = [8, 32], strides = [1, 1]} : vector<8x128xf32> to vector<8x32xf32>
    %23 = arith.negf %22 : vector<8x32xf32>
    %24 = math.exp %23 : vector<8x32xf32>
    %cst_14 = arith.constant 1.000000e+00 : f32
    %25 = vector.broadcast %cst_14 : f32 to vector<8x32xf32>
    %26 = arith.addf %25, %24 : vector<8x32xf32>
    %27 = arith.divf %25, %26 : vector<8x32xf32>
    %28 = vector.extract_strided_slice %15 {offsets = [0, 64], sizes = [8, 32], strides = [1, 1]} : vector<8x128xf32> to vector<8x32xf32>
    %29 = math.tanh %28 : vector<8x32xf32>
    %30 = vector.extract_strided_slice %15 {offsets = [0, 96], sizes = [8, 32], strides = [1, 1]} : vector<8x128xf32> to vector<8x32xf32>
    %31 = arith.negf %30 : vector<8x32xf32>
    %32 = math.exp %31 : vector<8x32xf32>
    %cst_15 = arith.constant 1.000000e+00 : f32
    %33 = vector.broadcast %cst_15 : f32 to vector<8x32xf32>
    %34 = arith.addf %33, %32 : vector<8x32xf32>
    %35 = arith.divf %33, %34 : vector<8x32xf32>
    %36 = arith.mulf %27, %9 : vector<8x32xf32>
    %37 = arith.mulf %21, %29 : vector<8x32xf32>
    %38 = arith.addf %36, %37 : vector<8x32xf32>
    %39 = math.tanh %38 : vector<8x32xf32>
    %40 = arith.mulf %35, %39 : vector<8x32xf32>
    %c1_i32 = arith.constant 1 : i32
    %c8_i32_16 = arith.constant 8 : i32
    %41 = arith.muli %c1_i32, %c8_i32_16 : i32
    %42 = tpu.assume_multiple %41, 8 : i32
    %43 = arith.index_cast %42 : i32 to index
    %c0_17 = arith.constant 0 : index
    %44 = vector.load %arg8[%43, %c0_17] : memref<64x128xf32, #tpu.memory_space<vmem>>, vector<8x128xf32>
    %cst_18 = arith.constant dense<0.000000e+00> : vector<8x128xf32>
    %45 = tpu.matmul %40, %7, %cst_18 {dimension_numbers = #tpu.dot_dimension_numbers<[1], [0], [0], [1], [0, 0, 1, 1], [], []>} : vector<8x32xf32>, vector<32x128xf32>, vector<8x128xf32> -> vector<8x128xf32>
    %46 = arith.addf %44, %45 : vector<8x128xf32>
    %47 = vector.extract_strided_slice %46 {offsets = [0, 0], sizes = [8, 32], strides = [1, 1]} : vector<8x128xf32> to vector<8x32xf32>
    %48 = arith.negf %47 : vector<8x32xf32>
    %49 = math.exp %48 : vector<8x32xf32>
    %cst_19 = arith.constant 1.000000e+00 : f32
    %50 = vector.broadcast %cst_19 : f32 to vector<8x32xf32>
    %51 = arith.addf %50, %49 : vector<8x32xf32>
    %52 = arith.divf %50, %51 : vector<8x32xf32>
    %53 = vector.extract_strided_slice %46 {offsets = [0, 32], sizes = [8, 32], strides = [1, 1]} : vector<8x128xf32> to vector<8x32xf32>
    %54 = arith.negf %53 : vector<8x32xf32>
    %55 = math.exp %54 : vector<8x32xf32>
    %cst_20 = arith.constant 1.000000e+00 : f32
    %56 = vector.broadcast %cst_20 : f32 to vector<8x32xf32>
    %57 = arith.addf %56, %55 : vector<8x32xf32>
    %58 = arith.divf %56, %57 : vector<8x32xf32>
    %59 = vector.extract_strided_slice %46 {offsets = [0, 64], sizes = [8, 32], strides = [1, 1]} : vector<8x128xf32> to vector<8x32xf32>
    %60 = math.tanh %59 : vector<8x32xf32>
    %61 = vector.extract_strided_slice %46 {offsets = [0, 96], sizes = [8, 32], strides = [1, 1]} : vector<8x128xf32> to vector<8x32xf32>
    %62 = arith.negf %61 : vector<8x32xf32>
    %63 = math.exp %62 : vector<8x32xf32>
    %cst_21 = arith.constant 1.000000e+00 : f32
    %64 = vector.broadcast %cst_21 : f32 to vector<8x32xf32>
    %65 = arith.addf %64, %63 : vector<8x32xf32>
    %66 = arith.divf %64, %65 : vector<8x32xf32>
    %67 = arith.mulf %58, %38 : vector<8x32xf32>
    %68 = arith.mulf %52, %60 : vector<8x32xf32>
    %69 = arith.addf %67, %68 : vector<8x32xf32>
    %70 = math.tanh %69 : vector<8x32xf32>
    %71 = arith.mulf %66, %70 : vector<8x32xf32>
    %c2_i32 = arith.constant 2 : i32
    %c8_i32_22 = arith.constant 8 : i32
    %72 = arith.muli %c2_i32, %c8_i32_22 : i32
    %73 = tpu.assume_multiple %72, 8 : i32
    %74 = arith.index_cast %73 : i32 to index
    %c0_23 = arith.constant 0 : index
    %75 = vector.load %arg8[%74, %c0_23] : memref<64x128xf32, #tpu.memory_space<vmem>>, vector<8x128xf32>
    %cst_24 = arith.constant dense<0.000000e+00> : vector<8x128xf32>
    %76 = tpu.matmul %71, %7, %cst_24 {dimension_numbers = #tpu.dot_dimension_numbers<[1], [0], [0], [1], [0, 0, 1, 1], [], []>} : vector<8x32xf32>, vector<32x128xf32>, vector<8x128xf32> -> vector<8x128xf32>
    %77 = arith.addf %75, %76 : vector<8x128xf32>
    %78 = vector.extract_strided_slice %77 {offsets = [0, 0], sizes = [8, 32], strides = [1, 1]} : vector<8x128xf32> to vector<8x32xf32>
    %79 = arith.negf %78 : vector<8x32xf32>
    %80 = math.exp %79 : vector<8x32xf32>
    %cst_25 = arith.constant 1.000000e+00 : f32
    %81 = vector.broadcast %cst_25 : f32 to vector<8x32xf32>
    %82 = arith.addf %81, %80 : vector<8x32xf32>
    %83 = arith.divf %81, %82 : vector<8x32xf32>
    %84 = vector.extract_strided_slice %77 {offsets = [0, 32], sizes = [8, 32], strides = [1, 1]} : vector<8x128xf32> to vector<8x32xf32>
    %85 = arith.negf %84 : vector<8x32xf32>
    %86 = math.exp %85 : vector<8x32xf32>
    %cst_26 = arith.constant 1.000000e+00 : f32
    %87 = vector.broadcast %cst_26 : f32 to vector<8x32xf32>
    %88 = arith.addf %87, %86 : vector<8x32xf32>
    %89 = arith.divf %87, %88 : vector<8x32xf32>
    %90 = vector.extract_strided_slice %77 {offsets = [0, 64], sizes = [8, 32], strides = [1, 1]} : vector<8x128xf32> to vector<8x32xf32>
    %91 = math.tanh %90 : vector<8x32xf32>
    %92 = vector.extract_strided_slice %77 {offsets = [0, 96], sizes = [8, 32], strides = [1, 1]} : vector<8x128xf32> to vector<8x32xf32>
    %93 = arith.negf %92 : vector<8x32xf32>
    %94 = math.exp %93 : vector<8x32xf32>
    %cst_27 = arith.constant 1.000000e+00 : f32
    %95 = vector.broadcast %cst_27 : f32 to vector<8x32xf32>
    %96 = arith.addf %95, %94 : vector<8x32xf32>
    %97 = arith.divf %95, %96 : vector<8x32xf32>
    %98 = arith.mulf %89, %69 : vector<8x32xf32>
    %99 = arith.mulf %83, %91 : vector<8x32xf32>
    %100 = arith.addf %98, %99 : vector<8x32xf32>
    %101 = math.tanh %100 : vector<8x32xf32>
    %102 = arith.mulf %97, %101 : vector<8x32xf32>
    %c3_i32 = arith.constant 3 : i32
    %c8_i32_28 = arith.constant 8 : i32
    %103 = arith.muli %c3_i32, %c8_i32_28 : i32
    %104 = tpu.assume_multiple %103, 8 : i32
    %105 = arith.index_cast %104 : i32 to index
    %c0_29 = arith.constant 0 : index
    %106 = vector.load %arg8[%105, %c0_29] : memref<64x128xf32, #tpu.memory_space<vmem>>, vector<8x128xf32>
    %cst_30 = arith.constant dense<0.000000e+00> : vector<8x128xf32>
    %107 = tpu.matmul %102, %7, %cst_30 {dimension_numbers = #tpu.dot_dimension_numbers<[1], [0], [0], [1], [0, 0, 1, 1], [], []>} : vector<8x32xf32>, vector<32x128xf32>, vector<8x128xf32> -> vector<8x128xf32>
    %108 = arith.addf %106, %107 : vector<8x128xf32>
    %109 = vector.extract_strided_slice %108 {offsets = [0, 0], sizes = [8, 32], strides = [1, 1]} : vector<8x128xf32> to vector<8x32xf32>
    %110 = arith.negf %109 : vector<8x32xf32>
    %111 = math.exp %110 : vector<8x32xf32>
    %cst_31 = arith.constant 1.000000e+00 : f32
    %112 = vector.broadcast %cst_31 : f32 to vector<8x32xf32>
    %113 = arith.addf %112, %111 : vector<8x32xf32>
    %114 = arith.divf %112, %113 : vector<8x32xf32>
    %115 = vector.extract_strided_slice %108 {offsets = [0, 32], sizes = [8, 32], strides = [1, 1]} : vector<8x128xf32> to vector<8x32xf32>
    %116 = arith.negf %115 : vector<8x32xf32>
    %117 = math.exp %116 : vector<8x32xf32>
    %cst_32 = arith.constant 1.000000e+00 : f32
    %118 = vector.broadcast %cst_32 : f32 to vector<8x32xf32>
    %119 = arith.addf %118, %117 : vector<8x32xf32>
    %120 = arith.divf %118, %119 : vector<8x32xf32>
    %121 = vector.extract_strided_slice %108 {offsets = [0, 64], sizes = [8, 32], strides = [1, 1]} : vector<8x128xf32> to vector<8x32xf32>
    %122 = math.tanh %121 : vector<8x32xf32>
    %123 = vector.extract_strided_slice %108 {offsets = [0, 96], sizes = [8, 32], strides = [1, 1]} : vector<8x128xf32> to vector<8x32xf32>
    %124 = arith.negf %123 : vector<8x32xf32>
    %125 = math.exp %124 : vector<8x32xf32>
    %cst_33 = arith.constant 1.000000e+00 : f32
    %126 = vector.broadcast %cst_33 : f32 to vector<8x32xf32>
    %127 = arith.addf %126, %125 : vector<8x32xf32>
    %128 = arith.divf %126, %127 : vector<8x32xf32>
    %129 = arith.mulf %120, %100 : vector<8x32xf32>
    %130 = arith.mulf %114, %122 : vector<8x32xf32>
    %131 = arith.addf %129, %130 : vector<8x32xf32>
    %132 = math.tanh %131 : vector<8x32xf32>
    %133 = arith.mulf %128, %132 : vector<8x32xf32>
    %c4_i32 = arith.constant 4 : i32
    %c8_i32_34 = arith.constant 8 : i32
    %134 = arith.muli %c4_i32, %c8_i32_34 : i32
    %135 = tpu.assume_multiple %134, 8 : i32
    %136 = arith.index_cast %135 : i32 to index
    %c0_35 = arith.constant 0 : index
    %137 = vector.load %arg8[%136, %c0_35] : memref<64x128xf32, #tpu.memory_space<vmem>>, vector<8x128xf32>
    %cst_36 = arith.constant dense<0.000000e+00> : vector<8x128xf32>
    %138 = tpu.matmul %133, %7, %cst_36 {dimension_numbers = #tpu.dot_dimension_numbers<[1], [0], [0], [1], [0, 0, 1, 1], [], []>} : vector<8x32xf32>, vector<32x128xf32>, vector<8x128xf32> -> vector<8x128xf32>
    %139 = arith.addf %137, %138 : vector<8x128xf32>
    %140 = vector.extract_strided_slice %139 {offsets = [0, 0], sizes = [8, 32], strides = [1, 1]} : vector<8x128xf32> to vector<8x32xf32>
    %141 = arith.negf %140 : vector<8x32xf32>
    %142 = math.exp %141 : vector<8x32xf32>
    %cst_37 = arith.constant 1.000000e+00 : f32
    %143 = vector.broadcast %cst_37 : f32 to vector<8x32xf32>
    %144 = arith.addf %143, %142 : vector<8x32xf32>
    %145 = arith.divf %143, %144 : vector<8x32xf32>
    %146 = vector.extract_strided_slice %139 {offsets = [0, 32], sizes = [8, 32], strides = [1, 1]} : vector<8x128xf32> to vector<8x32xf32>
    %147 = arith.negf %146 : vector<8x32xf32>
    %148 = math.exp %147 : vector<8x32xf32>
    %cst_38 = arith.constant 1.000000e+00 : f32
    %149 = vector.broadcast %cst_38 : f32 to vector<8x32xf32>
    %150 = arith.addf %149, %148 : vector<8x32xf32>
    %151 = arith.divf %149, %150 : vector<8x32xf32>
    %152 = vector.extract_strided_slice %139 {offsets = [0, 64], sizes = [8, 32], strides = [1, 1]} : vector<8x128xf32> to vector<8x32xf32>
    %153 = math.tanh %152 : vector<8x32xf32>
    %154 = vector.extract_strided_slice %139 {offsets = [0, 96], sizes = [8, 32], strides = [1, 1]} : vector<8x128xf32> to vector<8x32xf32>
    %155 = arith.negf %154 : vector<8x32xf32>
    %156 = math.exp %155 : vector<8x32xf32>
    %cst_39 = arith.constant 1.000000e+00 : f32
    %157 = vector.broadcast %cst_39 : f32 to vector<8x32xf32>
    %158 = arith.addf %157, %156 : vector<8x32xf32>
    %159 = arith.divf %157, %158 : vector<8x32xf32>
    %160 = arith.mulf %151, %131 : vector<8x32xf32>
    %161 = arith.mulf %145, %153 : vector<8x32xf32>
    %162 = arith.addf %160, %161 : vector<8x32xf32>
    %163 = math.tanh %162 : vector<8x32xf32>
    %164 = arith.mulf %159, %163 : vector<8x32xf32>
    %c5_i32 = arith.constant 5 : i32
    %c8_i32_40 = arith.constant 8 : i32
    %165 = arith.muli %c5_i32, %c8_i32_40 : i32
    %166 = tpu.assume_multiple %165, 8 : i32
    %167 = arith.index_cast %166 : i32 to index
    %c0_41 = arith.constant 0 : index
    %168 = vector.load %arg8[%167, %c0_41] : memref<64x128xf32, #tpu.memory_space<vmem>>, vector<8x128xf32>
    %cst_42 = arith.constant dense<0.000000e+00> : vector<8x128xf32>
    %169 = tpu.matmul %164, %7, %cst_42 {dimension_numbers = #tpu.dot_dimension_numbers<[1], [0], [0], [1], [0, 0, 1, 1], [], []>} : vector<8x32xf32>, vector<32x128xf32>, vector<8x128xf32> -> vector<8x128xf32>
    %170 = arith.addf %168, %169 : vector<8x128xf32>
    %171 = vector.extract_strided_slice %170 {offsets = [0, 0], sizes = [8, 32], strides = [1, 1]} : vector<8x128xf32> to vector<8x32xf32>
    %172 = arith.negf %171 : vector<8x32xf32>
    %173 = math.exp %172 : vector<8x32xf32>
    %cst_43 = arith.constant 1.000000e+00 : f32
    %174 = vector.broadcast %cst_43 : f32 to vector<8x32xf32>
    %175 = arith.addf %174, %173 : vector<8x32xf32>
    %176 = arith.divf %174, %175 : vector<8x32xf32>
    %177 = vector.extract_strided_slice %170 {offsets = [0, 32], sizes = [8, 32], strides = [1, 1]} : vector<8x128xf32> to vector<8x32xf32>
    %178 = arith.negf %177 : vector<8x32xf32>
    %179 = math.exp %178 : vector<8x32xf32>
    %cst_44 = arith.constant 1.000000e+00 : f32
    %180 = vector.broadcast %cst_44 : f32 to vector<8x32xf32>
    %181 = arith.addf %180, %179 : vector<8x32xf32>
    %182 = arith.divf %180, %181 : vector<8x32xf32>
    %183 = vector.extract_strided_slice %170 {offsets = [0, 64], sizes = [8, 32], strides = [1, 1]} : vector<8x128xf32> to vector<8x32xf32>
    %184 = math.tanh %183 : vector<8x32xf32>
    %185 = vector.extract_strided_slice %170 {offsets = [0, 96], sizes = [8, 32], strides = [1, 1]} : vector<8x128xf32> to vector<8x32xf32>
    %186 = arith.negf %185 : vector<8x32xf32>
    %187 = math.exp %186 : vector<8x32xf32>
    %cst_45 = arith.constant 1.000000e+00 : f32
    %188 = vector.broadcast %cst_45 : f32 to vector<8x32xf32>
    %189 = arith.addf %188, %187 : vector<8x32xf32>
    %190 = arith.divf %188, %189 : vector<8x32xf32>
    %191 = arith.mulf %182, %162 : vector<8x32xf32>
    %192 = arith.mulf %176, %184 : vector<8x32xf32>
    %193 = arith.addf %191, %192 : vector<8x32xf32>
    %194 = math.tanh %193 : vector<8x32xf32>
    %195 = arith.mulf %190, %194 : vector<8x32xf32>
    %c6_i32 = arith.constant 6 : i32
    %c8_i32_46 = arith.constant 8 : i32
    %196 = arith.muli %c6_i32, %c8_i32_46 : i32
    %197 = tpu.assume_multiple %196, 8 : i32
    %198 = arith.index_cast %197 : i32 to index
    %c0_47 = arith.constant 0 : index
    %199 = vector.load %arg8[%198, %c0_47] : memref<64x128xf32, #tpu.memory_space<vmem>>, vector<8x128xf32>
    %cst_48 = arith.constant dense<0.000000e+00> : vector<8x128xf32>
    %200 = tpu.matmul %195, %7, %cst_48 {dimension_numbers = #tpu.dot_dimension_numbers<[1], [0], [0], [1], [0, 0, 1, 1], [], []>} : vector<8x32xf32>, vector<32x128xf32>, vector<8x128xf32> -> vector<8x128xf32>
    %201 = arith.addf %199, %200 : vector<8x128xf32>
    %202 = vector.extract_strided_slice %201 {offsets = [0, 0], sizes = [8, 32], strides = [1, 1]} : vector<8x128xf32> to vector<8x32xf32>
    %203 = arith.negf %202 : vector<8x32xf32>
    %204 = math.exp %203 : vector<8x32xf32>
    %cst_49 = arith.constant 1.000000e+00 : f32
    %205 = vector.broadcast %cst_49 : f32 to vector<8x32xf32>
    %206 = arith.addf %205, %204 : vector<8x32xf32>
    %207 = arith.divf %205, %206 : vector<8x32xf32>
    %208 = vector.extract_strided_slice %201 {offsets = [0, 32], sizes = [8, 32], strides = [1, 1]} : vector<8x128xf32> to vector<8x32xf32>
    %209 = arith.negf %208 : vector<8x32xf32>
    %210 = math.exp %209 : vector<8x32xf32>
    %cst_50 = arith.constant 1.000000e+00 : f32
    %211 = vector.broadcast %cst_50 : f32 to vector<8x32xf32>
    %212 = arith.addf %211, %210 : vector<8x32xf32>
    %213 = arith.divf %211, %212 : vector<8x32xf32>
    %214 = vector.extract_strided_slice %201 {offsets = [0, 64], sizes = [8, 32], strides = [1, 1]} : vector<8x128xf32> to vector<8x32xf32>
    %215 = math.tanh %214 : vector<8x32xf32>
    %216 = vector.extract_strided_slice %201 {offsets = [0, 96], sizes = [8, 32], strides = [1, 1]} : vector<8x128xf32> to vector<8x32xf32>
    %217 = arith.negf %216 : vector<8x32xf32>
    %218 = math.exp %217 : vector<8x32xf32>
    %cst_51 = arith.constant 1.000000e+00 : f32
    %219 = vector.broadcast %cst_51 : f32 to vector<8x32xf32>
    %220 = arith.addf %219, %218 : vector<8x32xf32>
    %221 = arith.divf %219, %220 : vector<8x32xf32>
    %222 = arith.mulf %213, %193 : vector<8x32xf32>
    %223 = arith.mulf %207, %215 : vector<8x32xf32>
    %224 = arith.addf %222, %223 : vector<8x32xf32>
    %225 = math.tanh %224 : vector<8x32xf32>
    %226 = arith.mulf %221, %225 : vector<8x32xf32>
    %c7_i32 = arith.constant 7 : i32
    %c8_i32_52 = arith.constant 8 : i32
    %227 = arith.muli %c7_i32, %c8_i32_52 : i32
    %228 = tpu.assume_multiple %227, 8 : i32
    %229 = arith.index_cast %228 : i32 to index
    %c0_53 = arith.constant 0 : index
    %230 = vector.load %arg8[%229, %c0_53] : memref<64x128xf32, #tpu.memory_space<vmem>>, vector<8x128xf32>
    %cst_54 = arith.constant dense<0.000000e+00> : vector<8x128xf32>
    %231 = tpu.matmul %226, %7, %cst_54 {dimension_numbers = #tpu.dot_dimension_numbers<[1], [0], [0], [1], [0, 0, 1, 1], [], []>} : vector<8x32xf32>, vector<32x128xf32>, vector<8x128xf32> -> vector<8x128xf32>
    %232 = arith.addf %230, %231 : vector<8x128xf32>
    %233 = vector.extract_strided_slice %232 {offsets = [0, 0], sizes = [8, 32], strides = [1, 1]} : vector<8x128xf32> to vector<8x32xf32>
    %234 = arith.negf %233 : vector<8x32xf32>
    %235 = math.exp %234 : vector<8x32xf32>
    %cst_55 = arith.constant 1.000000e+00 : f32
    %236 = vector.broadcast %cst_55 : f32 to vector<8x32xf32>
    %237 = arith.addf %236, %235 : vector<8x32xf32>
    %238 = arith.divf %236, %237 : vector<8x32xf32>
    %239 = vector.extract_strided_slice %232 {offsets = [0, 32], sizes = [8, 32], strides = [1, 1]} : vector<8x128xf32> to vector<8x32xf32>
    %240 = arith.negf %239 : vector<8x32xf32>
    %241 = math.exp %240 : vector<8x32xf32>
    %cst_56 = arith.constant 1.000000e+00 : f32
    %242 = vector.broadcast %cst_56 : f32 to vector<8x32xf32>
    %243 = arith.addf %242, %241 : vector<8x32xf32>
    %244 = arith.divf %242, %243 : vector<8x32xf32>
    %245 = vector.extract_strided_slice %232 {offsets = [0, 64], sizes = [8, 32], strides = [1, 1]} : vector<8x128xf32> to vector<8x32xf32>
    %246 = math.tanh %245 : vector<8x32xf32>
    %247 = vector.extract_strided_slice %232 {offsets = [0, 96], sizes = [8, 32], strides = [1, 1]} : vector<8x128xf32> to vector<8x32xf32>
    %248 = arith.negf %247 : vector<8x32xf32>
    %249 = math.exp %248 : vector<8x32xf32>
    %cst_57 = arith.constant 1.000000e+00 : f32
    %250 = vector.broadcast %cst_57 : f32 to vector<8x32xf32>
    %251 = arith.addf %250, %249 : vector<8x32xf32>
    %252 = arith.divf %250, %251 : vector<8x32xf32>
    %253 = arith.mulf %244, %224 : vector<8x32xf32>
    %254 = arith.mulf %238, %246 : vector<8x32xf32>
    %255 = arith.addf %253, %254 : vector<8x32xf32>
    %256 = math.tanh %255 : vector<8x32xf32>
    %257 = arith.mulf %252, %256 : vector<8x32xf32>
    %c8_i32_58 = arith.constant 8 : i32
    %c0_59 = arith.constant 0 : index
    %c0_60 = arith.constant 0 : index
    %258 = vector.load %arg5[%c0_59, %c0_60] : memref<32x128xf32, #tpu.memory_space<vmem>>, vector<32x128xf32>
    %cst_61 = arith.constant dense<0.000000e+00> : vector<8x128xf32>
    %259 = tpu.matmul %257, %258, %cst_61 {dimension_numbers = #tpu.dot_dimension_numbers<[1], [0], [0], [1], [0, 0, 1, 1], [], []>} : vector<8x32xf32>, vector<32x128xf32>, vector<8x128xf32> -> vector<8x128xf32>
    %c0_62 = arith.constant 0 : index
    %c0_63 = arith.constant 0 : index
    %260 = vector.load %arg6[%c0_62, %c0_63] : memref<1x128xf32, #tpu.memory_space<vmem>>, vector<1x128xf32>
    %261 = vector.broadcast %260 : vector<1x128xf32> to vector<8x128xf32>
    %262 = arith.addf %259, %261 : vector<8x128xf32>
    %c0_64 = arith.constant 0 : index
    %c0_65 = arith.constant 0 : index
    %263 = vector.load %arg7[%c0_64, %c0_65] : memref<8x128xf32, #tpu.memory_space<vmem>>, vector<8x128xf32>
    tpu.vector_store %arg7[%c0_64, %c0_65], %262 {strides = array<i32>} : memref<8x128xf32, #tpu.memory_space<vmem>>, vector<8x128xf32>,
    return
  }
  func.func @transform_0(%arg0: i32) -> (i32, i32) {
    %c0_i32 = arith.constant 0 : i32
    %c0_i32_0 = arith.constant 0 : i32
    %c0_i32_1 = arith.constant 0 : i32
    return %c0_i32, %c0_i32_0 : i32, i32
  }
  func.func @transform_1(%arg0: i32) -> (i32, i32) {
    %c0_i32 = arith.constant 0 : i32
    %c0_i32_0 = arith.constant 0 : i32
    %c0_i32_1 = arith.constant 0 : i32
    return %c0_i32, %c0_i32_0 : i32, i32
  }
  func.func @transform_2(%arg0: i32) -> (i32, i32) {
    %c0_i32 = arith.constant 0 : i32
    %c0_i32_0 = arith.constant 0 : i32
    %c0_i32_1 = arith.constant 0 : i32
    return %c0_i32, %c0_i32_0 : i32, i32
  }
  func.func @transform_3(%arg0: i32) -> (i32, i32) {
    %c0_i32 = arith.constant 0 : i32
    %c0_i32_0 = arith.constant 0 : i32
    %c0_i32_1 = arith.constant 0 : i32
    return %c0_i32, %c0_i32_0 : i32, i32
  }
  func.func @transform_4(%arg0: i32) -> (i32, i32) {
    %c0_i32 = arith.constant 0 : i32
    %c0_i32_0 = arith.constant 0 : i32
    %c0_i32_1 = arith.constant 0 : i32
    return %c0_i32, %c0_i32_0 : i32, i32
  }
  func.func @transform_5(%arg0: i32) -> (i32, i32) {
    %c0_i32 = arith.constant 0 : i32
    %c0_i32_0 = arith.constant 0 : i32
    %c0_i32_1 = arith.constant 0 : i32
    return %c0_i32, %c0_i32_0 : i32, i32
  }
  func.func @transform_6(%arg0: i32) -> (i32, i32) {
    %c0_i32 = arith.constant 0 : i32
    %c0_i32_0 = arith.constant 0 : i32
    %c0_i32_1 = arith.constant 0 : i32
    return %c0_i32, %c0_i32_0 : i32, i32
  }
}

</mosaic_0001>

<bundles_post_ra>
// kernel: tpu_custom_call.1
= control target key start
LH: loop header
LB: loop body
LE: loop exit
PB: predicated region body
PF: predicated region fallthrough
CT: control target
= control target key end

     0   :  { %vm43_vm0 = vcmask 261120   ;;  %v1457_v4 = vmov 0.0|0.0   ;;  %vm1458_vm1 = vmmov 0   ;;  %v1459_v13 = vmov 0.0   ;;  %s1703_s0 = inlined_call_operand.vmem [shape: f32[64,32], index: 0, kind: input, shape index: {}]   ;;  %s1704_s1 = inlined_call_operand.vmem [shape: f32[32,128], index: 1, kind: input, shape index: {}]   ;;  %s1705_s2 = inlined_call_operand.vmem [shape: f32[32,128], index: 2, kind: input, shape index: {}]   ;;  %s1706_s3 = inlined_call_operand.vmem [shape: f32[1,128], index: 3, kind: input, shape index: {}]   ;;  %s1707_s4 = inlined_call_operand.vmem [shape: f32[32,128], index: 4, kind: input, shape index: {}]   ;;  %s1708_s5 = inlined_call_operand.vmem [shape: f32[1,128], index: 5, kind: input, shape index: {}]   ;;  %s1709_s6 = inlined_call_operand.hbm [shape: f32[8,128], index: 6, kind: output, shape index: {}]  }
   0x1   :  { %v32_v0 = vld [vmem:[%s1704_s1] sm:$0xff]  ;;  %v33_v1 = vld [vmem:[%s1704_s1 + $0x8] sm:$0xff]  ;;  %1309 = vmatprep.subr.bf16.mxu1 %v1457_v4  ;;  %v34_v6 = vld [vmem:[%s1704_s1 + $0x10] sm:$0xff]  ;;  %1210 = vmatprep.mubr.msk.f32.mxu1 %vm1458_vm1, %v1459_v13 }
   0x2   :  { %v181_v2 = vld [vmem:[%s1705_s2] sm:$0xff]  ;;  %v1301_v3 = vpack.c.bf16 %v33_v1, %v32_v0  ;;  %v182_v5 = vld [vmem:[%s1705_s2 + $0x8] sm:$0xff]  ;;  %v35_v7 = vld [vmem:[%s1704_s1 + $0x18] sm:$0xff] }
   0x3   :  { %v1517_v8 = vpack.c.bf16 %v182_v5, %v181_v2  ;;  %v1305_v9 = vpack.c.bf16 %v35_v7, %v34_v6  ;;  %v24_v10 = vld [vmem:[%s1703_s0] sm:$0xff]  ;;  %v183_v11 = vld [vmem:[%s1705_s2 + $0x10] sm:$0xff]  ;;  %v184_v12 = vld [vmem:[%s1705_s2 + $0x18] sm:$0xff] }
   0x4   :  { %1302 = vmatprep.subr.bf16.mxu0 %v1301_v3  ;;  %1190 = vmatprep.mubr.msk.f32.mxu0 %vm43_vm0, %v24_v10 }
   0x5   :  { %11 = vsyncpa [#allocation4], 0  ;;  %1304 = vmatpush3.bf16.msra.mxu0 %v1301_v3  ;;  %1311 = vmatpush3.bf16.msra.mxu1 %v1517_v8  ;;  %v1532_v14 = vpack.c.bf16 %v184_v12, %v183_v11  ;;  %v25_v15 = vld [vmem:[%s1703_s0 + $0x8] sm:$0xff]  ;;  %v1556_v16 = vld [vmem:[%s1706_s3] ss:$0 sm:$0xff]  ;;  %s1460_s17 = smov 64  }
   0x6   :  { %1306 = vmatprep.subr.bf16.mxu0 %v1305_v9  ;;  %1312 = vmatprep.subr.bf16.mxu1 %v1457_v4  ;;  %s1461_s3 = smov 32   ;;  %v26_v51 = vld [vmem:[%s1703_s0 + $0x10] sm:$0xff]  ;;  %v27_v52 = vld [vmem:[%s1703_s0 + $0x18] sm:$0xff]  ;;  %v28_v53 = vld [vmem:[%s1703_s0 + $0x20] sm:$0xff] }
   0x7   :  { %v29_v54 = vld [vmem:[%s1703_s0 + $0x28] sm:$0xff]  ;;  %v30_v55 = vld [vmem:[%s1703_s0 + $0x30] sm:$0xff]  ;;  %v31_v56 = vld [vmem:[%s1703_s0 + $0x38] sm:$0xff] }
   0x9   :  { %1308 = vmatpush3.bf16.msra.mxu0 %v1305_v9  ;;  %1314 = vmatpush3.bf16.msra.mxu1 %v1532_v14 }
   0xa   :  { %1315 = vmatprep.subr.bf16.mxu1 %v1457_v4  ;;  %1321 = vmatprep.subr.bf16.mxu0 %v1457_v4 }
   0xc   :  { %1191 = vmatmul.mubr.msk.f32.vlgmr.msra.gmra.mrb[0].mxu0 %vm43_vm0, %v25_v15  ;;  %1211 = vmatmul.mubr.f32.vlgmr.msra.gmra.mrb[0].mxu1 %v1459_v13 }
   0xd   :  { %1317 = vmatpush3.bf16.msra.mxu1 %v1517_v8  ;;  %1221 = vmatprep.mubr.msk.f32.mxu1 %vm1458_vm1, %v1459_v13 }
   0xe   :  { %1318 = vmatprep.subr.bf16.mxu1 %v1457_v4  ;;  %1323 = vmatpush3.bf16.msra.mxu0 %v1517_v8 }
   0xf   :  { %1324 = vmatprep.subr.bf16.mxu0 %v1457_v4  ;;  %1193 = vmatprep.mubr.msk.f32.mxu0 %vm43_vm0, %v26_v51 }
  0x10   :  { %1194 = vmatmul.mubr.msk.f32.gmra.mrb[2].mxu0 %vm43_vm0, %v27_v52 }
  0x11   :  { %1320 = vmatpush3.bf16.msra.mxu1 %v1532_v14  ;;  %1196 = vmatprep.mubr.msk.f32.mxu0 %vm43_vm0, %v28_v53 }
  0x12   :  { %1326 = vmatpush3.bf16.msra.mxu0 %v1532_v14  ;;  %1327 = vmatprep.subr.bf16.mxu1 %v1457_v4 }
  0x13   :  { %1333 = vmatprep.subr.bf16.mxu0 %v1457_v4 }
  0x14   :  { %1197 = vmatmul.mubr.msk.f32.gmra.mrb[4].mxu0 %vm43_vm0, %v29_v54 }
  0x15   :  { %1199 = vmatprep.mubr.msk.f32.mxu0 %vm43_vm0, %v30_v55 }
  0x18   :  { %1200 = vmatmul.mubr.msk.f32.gmra.mrb[6].mxu0 %vm43_vm0, %v31_v56 }
  0x19   :  { %1232 = vmatprep.mubr.msk.f32.mxu0 %vm1458_vm1, %v1459_v13 }
  0xdf   :  { %v1192_v17 = vpop.f32.mrb[0].mxu0  ;;  %v255_v18 = vpop.f32.mrb[0].mxu1 }
  0xe0   :  { %v134_v19 = vpop.f32.mrb[1].mxu0  ;;  %v1212_v20 = vpop.f32.mrb[1].mxu1  ;;  %v140_v37 = vadd.f32 %v1192_v17, %v1556_v16 }
  0xe1   :  { %v135_v21 = vadd.f32 %v1556_v16, %v134_v19 }
  0xe3   :  { %v259_v22 = vadd.f32 %v255_v18, %v135_v21  ;;  %v1195_v60 = vpop.f32.mrb[2].mxu0 }
  0xe4   :  { %v144_v61 = vpop.f32.mrb[3].mxu0 }
  0xe5   :  { %1369 = vtanh.f32 %v259_v22  ;;  %v1108_v24 = vmul.f32 -1.442695, %v259_v22  ;;  %v145_v3 = vadd.f32 %v1556_v16, %v144_v61 }
  0xe7   :  { %1371 = vpow2.f32 %v1108_v24  ;;  %v1601_v62 = vpop.f32.mrb[4].mxu0 }
  0xe8   :  { %v1603_v63 = vpop.f32.mrb[5].mxu0 }
  0xeb   :  { %v1605_v0 = vpop.f32.mrb[6].mxu0 }
  0xec   :  { %v1607_v1 = vpop.f32.mrb[7].mxu0 }
  0xef   :  { %v1370_v23 = vpop.eup %1369 }
  0xf0   :  { %269 = vrot.lane.b32.xlu0 %v1370_v23, %s1460_s17 }
  0xf1   :  { %v1372_v25 = vpop.eup %1371 }
  0xf2   :  { %v263_v26 = vadd.f32 1.0, %v1372_v25 }
  0xf4   :  { %1373 = vrcp.f32 %v263_v26  ;;  %v150_v26 = vadd.f32 %v1195_v60, %v1556_v16 }
  0xfe   :  { %v1374_v27 = vpop.eup %1373 }
  0xff   :  { %v267_v30 = vmul.f32 0.0, %v1374_v27 }
 0x162   :  { %v270_v28 = vpop.permute.xlu0 %269 }
 0x163   :  { %v272_v29 = vmul.f32 %v1374_v27, %v270_v28 }
 0x165   :  { %274 = vrot.lane.b32.xlu0 %v272_v29, %s1461_s3 }
 0x1d7   :  { %v275_v31 = vpop.permute.xlu0 %274 }
 0x1d8   :  { %v277_v32 = vadd.f32 %v275_v31, %v267_v30 }
 0x1da   :  { %1375 = vtanh.f32 %v277_v32 }
 0x1e4   :  { %v1376_v33 = vpop.eup %1375 }
 0x1e5   :  { %280 = vrot.lane.b32.xlu1 %v1376_v33, %s1460_s17 }
 0x257   :  { %v281_v34 = vpop.permute.xlu1 %280 }
 0x258   :  { %v283_v35 = vmul.f32 %v1374_v27, %v281_v34 }
 0x25a   :  { %287 = vrot.lane.b32.xlu1 %v283_v35, %s1461_s3 }
 0x2cc   :  { %v288_v36 = vpop.permute.xlu1 %287 }
 0x2cd   :  { %1222 = vmatmul.mubr.msk.f32.vlgmr.msra.gmra.mrb[2].mxu1 %vm43_vm0, %v288_v36 }
 0x2ce   :  { %1329 = vmatpush3.bf16.msra.mxu1 %v1517_v8  ;;  %1243 = vmatprep.mubr.msk.f32.mxu1 %vm1458_vm1, %v1459_v13 }
 0x2cf   :  { %1330 = vmatprep.subr.bf16.mxu1 %v1457_v4 }
 0x2d2   :  { %1332 = vmatpush3.bf16.msra.mxu1 %v1532_v14 }
 0x2d3   :  { %1339 = vmatprep.subr.bf16.mxu1 %v1457_v4 }
 0x3a0   :  { %v357_v38 = vpop.f32.mrb[2].mxu1 }
 0x3a1   :  { %v361_v39 = vadd.f32 %v357_v38, %v140_v37  ;;  %v1223_v40 = vpop.f32.mrb[3].mxu1 }
 0x3a3   :  { %1377 = vtanh.f32 %v361_v39  ;;  %v1110_v42 = vmul.f32 -1.442695, %v361_v39 }
 0x3a5   :  { %1379 = vpow2.f32 %v1110_v42 }
 0x3ad   :  { %v1378_v41 = vpop.eup %1377 }
 0x3ae   :  { %371 = vrot.lane.b32.xlu0 %v1378_v41, %s1460_s17 }
 0x3af   :  { %v1380_v43 = vpop.eup %1379 }
 0x3b0   :  { %v365_v44 = vadd.f32 1.0, %v1380_v43 }
 0x3b2   :  { %1381 = vrcp.f32 %v365_v44  ;;  %v155_v44 = vadd.f32 %v1556_v16, %v1603_v63  ;;  %v160_v63 = vadd.f32 %v1601_v62, %v1556_v16 }
 0x3bc   :  { %v1382_v45 = vpop.eup %1381 }
 0x3bd   :  { %v369_v48 = vmul.f32 %v1382_v45, %v277_v32 }
 0x420   :  { %v372_v46 = vpop.permute.xlu0 %371 }
 0x421   :  { %v374_v47 = vmul.f32 %v1382_v45, %v372_v46 }
 0x423   :  { %376 = vrot.lane.b32.xlu1 %v374_v47, %s1461_s3 }
 0x495   :  { %v377_v49 = vpop.permute.xlu1 %376 }
 0x496   :  { %v379_v50 = vadd.f32 %v377_v49, %v369_v48 }
 0x498   :  { %1383 = vtanh.f32 %v379_v50 }
 0x4a2   :  { %v1384_v57 = vpop.eup %1383 }
 0x4a3   :  { %382 = vrot.lane.b32.xlu0 %v1384_v57, %s1460_s17 }
 0x515   :  { %v383_v58 = vpop.permute.xlu0 %382 }
 0x516   :  { %v385_v59 = vmul.f32 %v1382_v45, %v383_v58 }
 0x518   :  { %389 = vrot.lane.b32.xlu1 %v385_v59, %s1461_s3 }
 0x58a   :  { %v390_v2 = vpop.permute.xlu1 %389 }
 0x58b   :  { %1233 = vmatmul.mubr.msk.f32.vlgmr.msra.gmra.mrb[8].mxu0 %vm43_vm0, %v390_v2 }
 0x58c   :  { %1335 = vmatpush3.bf16.msra.mxu0 %v1517_v8  ;;  %1254 = vmatprep.mubr.msk.f32.mxu0 %vm1458_vm1, %v1459_v13 }
 0x58d   :  { %1336 = vmatprep.subr.bf16.mxu0 %v1457_v4 }
 0x590   :  { %1338 = vmatpush3.bf16.msra.mxu0 %v1532_v14 }
 0x591   :  { %1345 = vmatprep.subr.bf16.mxu0 %v1457_v4 }
 0x65e   :  { %v459_v5 = vpop.f32.mrb[8].mxu0 }
 0x65f   :  { %v463_v6 = vadd.f32 %v459_v5, %v145_v3  ;;  %v1234_v7 = vpop.f32.mrb[9].mxu0 }
 0x661   :  { %1385 = vtanh.f32 %v463_v6  ;;  %v1112_v10 = vmul.f32 -1.442695, %v463_v6 }
 0x663   :  { %1387 = vpow2.f32 %v1112_v10 }
 0x66b   :  { %v1386_v9 = vpop.eup %1385 }
 0x66c   :  { %473 = vrot.lane.b32.xlu0 %v1386_v9, %s1460_s17 }
 0x66d   :  { %v1388_v11 = vpop.eup %1387 }
 0x66e   :  { %v467_v12 = vadd.f32 1.0, %v1388_v11 }
 0x670   :  { %1389 = vrcp.f32 %v467_v12 }
 0x67a   :  { %v1390_v15 = vpop.eup %1389 }
 0x67b   :  { %v471_v19 = vmul.f32 %v1390_v15, %v379_v50 }
 0x6de   :  { %v474_v17 = vpop.permute.xlu0 %473 }
 0x6df   :  { %v476_v18 = vmul.f32 %v1390_v15, %v474_v17 }
 0x6e1   :  { %478 = vrot.lane.b32.xlu1 %v476_v18, %s1461_s3 }
 0x753   :  { %v479_v20 = vpop.permute.xlu1 %478 }
 0x754   :  { %v481_v21 = vadd.f32 %v479_v20, %v471_v19 }
 0x756   :  { %1391 = vtanh.f32 %v481_v21 }
 0x760   :  { %v1392_v22 = vpop.eup %1391 }
 0x761   :  { %484 = vrot.lane.b32.xlu0 %v1392_v22, %s1460_s17 }
 0x7d3   :  { %v485_v23 = vpop.permute.xlu0 %484 }
 0x7d4   :  { %v487_v24 = vmul.f32 %v1390_v15, %v485_v23 }
 0x7d6   :  { %491 = vrot.lane.b32.xlu1 %v487_v24, %s1461_s3 }
 0x848   :  { %v492_v25 = vpop.permute.xlu1 %491 }
 0x849   :  { %1244 = vmatmul.mubr.msk.f32.vlgmr.msra.gmra.mrb[4].mxu1 %vm43_vm0, %v492_v25 }
 0x84a   :  { %1341 = vmatpush3.bf16.msra.mxu1 %v1517_v8  ;;  %1265 = vmatprep.mubr.msk.f32.mxu1 %vm1458_vm1, %v1459_v13 }
 0x84b   :  { %1342 = vmatprep.subr.bf16.mxu1 %v1457_v4 }
 0x84e   :  { %1344 = vmatpush3.bf16.msra.mxu1 %v1532_v14 }
 0x84f   :  { %1351 = vmatprep.subr.bf16.mxu1 %v1457_v4 }
 0x91c   :  { %v561_v27 = vpop.f32.mrb[4].mxu1 }
 0x91d   :  { %v565_v28 = vadd.f32 %v561_v27, %v150_v26  ;;  %v1245_v29 = vpop.f32.mrb[5].mxu1 }
 0x91f   :  { %1393 = vtanh.f32 %v565_v28  ;;  %v1114_v31 = vmul.f32 -1.442695, %v565_v28 }
 0x921   :  { %1395 = vpow2.f32 %v1114_v31 }
 0x929   :  { %v1394_v30 = vpop.eup %1393 }
 0x92a   :  { %575 = vrot.lane.b32.xlu0 %v1394_v30, %s1460_s17 }
 0x92b   :  { %v1396_v32 = vpop.eup %1395 }
 0x92c   :  { %v569_v33 = vadd.f32 1.0, %v1396_v32 }
 0x92e   :  { %1397 = vrcp.f32 %v569_v33 }
 0x938   :  { %v1398_v34 = vpop.eup %1397 }
 0x939   :  { %v573_v37 = vmul.f32 %v1398_v34, %v481_v21  ;;  %v165_v21 = vadd.f32 %v1556_v16, %v1607_v1 }
 0x99c   :  { %v576_v35 = vpop.permute.xlu0 %575 }
 0x99d   :  { %v578_v36 = vmul.f32 %v1398_v34, %v576_v35 }
 0x99f   :  { %580 = vrot.lane.b32.xlu1 %v578_v36, %s1461_s3 }
 0xa11   :  { %v581_v38 = vpop.permute.xlu1 %580 }
 0xa12   :  { %v583_v39 = vadd.f32 %v581_v38, %v573_v37  ;;  %v170_v37 = vadd.f32 %v1605_v0, %v1556_v16  ;;  %v998_v0 = vld [vmem:[%s1707_s4] sm:$0xff] }
 0xa14   :  { %1399 = vtanh.f32 %v583_v39 }
 0xa1e   :  { %v1400_v40 = vpop.eup %1399 }
 0xa1f   :  { %586 = vrot.lane.b32.xlu0 %v1400_v40, %s1460_s17 }
 0xa91   :  { %v587_v41 = vpop.permute.xlu0 %586 }
 0xa92   :  { %v589_v42 = vmul.f32 %v1398_v34, %v587_v41 }
 0xa94   :  { %593 = vrot.lane.b32.xlu1 %v589_v42, %s1461_s3 }
 0xb06   :  { %v594_v43 = vpop.permute.xlu1 %593 }
 0xb07   :  { %1255 = vmatmul.mubr.msk.f32.vlgmr.msra.gmra.mrb[10].mxu0 %vm43_vm0, %v594_v43 }
 0xb08   :  { %1347 = vmatpush3.bf16.msra.mxu0 %v1517_v8  ;;  %1276 = vmatprep.mubr.msk.f32.mxu0 %vm1458_vm1, %v1459_v13 }
 0xb09   :  { %1348 = vmatprep.subr.bf16.mxu0 %v1457_v4 }
 0xb0c   :  { %1350 = vmatpush3.bf16.msra.mxu0 %v1532_v14 }
 0xb0d   :  { %1357 = vmatprep.subr.bf16.mxu0 %v1457_v4 }
 0xbda   :  { %v663_v45 = vpop.f32.mrb[10].mxu0 }
 0xbdb   :  { %v667_v46 = vadd.f32 %v663_v45, %v155_v44  ;;  %v1256_v47 = vpop.f32.mrb[11].mxu0 }
 0xbdd   :  { %1401 = vtanh.f32 %v667_v46  ;;  %v1116_v49 = vmul.f32 -1.442695, %v667_v46 }
 0xbdf   :  { %1403 = vpow2.f32 %v1116_v49 }
 0xbe7   :  { %v1402_v48 = vpop.eup %1401 }
 0xbe8   :  { %677 = vrot.lane.b32.xlu0 %v1402_v48, %s1460_s17 }
 0xbe9   :  { %v1404_v50 = vpop.eup %1403 }
 0xbea   :  { %v671_v51 = vadd.f32 1.0, %v1404_v50  ;;  %v999_v50 = vld [vmem:[%s1707_s4 + $0x8] sm:$0xff] }
 0xbec   :  { %1405 = vrcp.f32 %v671_v51  ;;  %v1000_v51 = vld [vmem:[%s1707_s4 + $0x10] sm:$0xff] }
 0xbf6   :  { %v1406_v52 = vpop.eup %1405 }
 0xbf7   :  { %v675_v55 = vmul.f32 %v1406_v52, %v583_v39 }
 0xc5a   :  { %v678_v53 = vpop.permute.xlu0 %677 }
 0xc5b   :  { %v680_v54 = vmul.f32 %v1406_v52, %v678_v53  ;;  %v1001_v53 = vld [vmem:[%s1707_s4 + $0x18] sm:$0xff]  ;;  %s1462_s4 = smov [#allocation3]  }
 0xc5c   :  { %s1091_s1 = sshll.u32 %s1462_s4, 4  ;;  %s1092_s1 = int_to_ptr.vmem [resolvable:$true] %s1091_s1 }
 0xc5d   :  { %682 = vrot.lane.b32.xlu1 %v680_v54, %s1461_s3  ;;  %v1361_v54 = vpack.c.bf16 %v1001_v53, %v1000_v51  ;;  %s1433_s2 = scalar_lea.vmem %s1092_s1, 128  ;;  %p1438_p1 = scmp.lt.s32.totalorder %s1092_s1, %s1092_s1 }
 0xc5e   :  { %p1434_p0 = scmp.ne.s32.totalorder %s1092_s1, %s1433_s2  ;;  %p1439_p2 = scmp.lt.s32.totalorder %s1433_s2, %s1433_s2 }
 0xc60   :  { %p1440_p3 = por %p1439_p2, %p1438_p1 }
 0xc62   :  { %p1441_p4 = pnand %p1440_p3, %p1434_p0 }
 0xccf   :  { %v683_v56 = vpop.permute.xlu1 %682 }
 0xcd0   :  { %v685_v57 = vadd.f32 %v683_v56, %v675_v55 }
 0xcd2   :  { %1407 = vtanh.f32 %v685_v57 }
 0xcdc   :  { %v1408_v58 = vpop.eup %1407 }
 0xcdd   :  { %688 = vrot.lane.b32.xlu0 %v1408_v58, %s1460_s17 }
 0xd4f   :  { %v689_v59 = vpop.permute.xlu0 %688 }
 0xd50   :  { %v691_v60 = vmul.f32 %v1406_v52, %v689_v59  ;;  %v1358_v52 = vpack.c.bf16 %v999_v50, %v998_v0  ;;  %v1123_v59 = vld [vmem:[%s1708_s5] ss:$0 sm:$0xff] }
 0xd52   :  { %695 = vrot.lane.b32.xlu1 %v691_v60, %s1461_s3 }
 0xdc4   :  { %v696_v61 = vpop.permute.xlu1 %695 }
 0xdc5   :  { %1266 = vmatmul.mubr.msk.f32.vlgmr.msra.gmra.mrb[6].mxu1 %vm43_vm0, %v696_v61 }
 0xdc6   :  { %1353 = vmatpush3.bf16.msra.mxu1 %v1517_v8  ;;  %1287 = vmatprep.mubr.msk.f32.mxu1 %vm1458_vm1, %v1459_v13 }
 0xdc7   :  { %1354 = vmatprep.subr.bf16.mxu1 %v1457_v4 }
 0xdca   :  { %1356 = vmatpush3.bf16.msra.mxu1 %v1532_v14 }
 0xe98   :  { %v765_v2 = vpop.f32.mrb[6].mxu1 }
 0xe99   :  { %v769_v3 = vadd.f32 %v765_v2, %v160_v63  ;;  %v1267_v5 = vpop.f32.mrb[7].mxu1 }
 0xe9b   :  { %1409 = vtanh.f32 %v769_v3  ;;  %v1118_v7 = vmul.f32 -1.442695, %v769_v3 }
 0xe9d   :  { %1411 = vpow2.f32 %v1118_v7 }
 0xea5   :  { %v1410_v6 = vpop.eup %1409 }
 0xea6   :  { %779 = vrot.lane.b32.xlu0 %v1410_v6, %s1460_s17 }
 0xea7   :  { %v1412_v8 = vpop.eup %1411 }
 0xea8   :  { %v773_v9 = vadd.f32 1.0, %v1412_v8 }
 0xeaa   :  { %1413 = vrcp.f32 %v773_v9 }
 0xeb4   :  { %v1414_v10 = vpop.eup %1413 }
 0xeb5   :  { %v777_v14 = vmul.f32 %v1414_v10, %v685_v57 }
 0xf18   :  { %v780_v11 = vpop.permute.xlu0 %779 }
 0xf19   :  { %v782_v12 = vmul.f32 %v1414_v10, %v780_v11 }
 0xf1b   :  { %784 = vrot.lane.b32.xlu1 %v782_v12, %s1461_s3 }
 0xf8d   :  { %v785_v15 = vpop.permute.xlu1 %784 }
 0xf8e   :  { %v787_v62 = vadd.f32 %v785_v15, %v777_v14 }
 0xf90   :  { %1415 = vtanh.f32 %v787_v62 }
 0xf9a   :  { %v1416_v17 = vpop.eup %1415 }
 0xf9b   :  { %790 = vrot.lane.b32.xlu0 %v1416_v17, %s1460_s17 }
0x100d   :  { %v791_v18 = vpop.permute.xlu0 %790 }
0x100e   :  { %v793_v19 = vmul.f32 %v1414_v10, %v791_v18 }
0x1010   :  { %797 = vrot.lane.b32.xlu1 %v793_v19, %s1461_s3 }
0x1082   :  { %v798_v20 = vpop.permute.xlu1 %797 }
0x1083   :  { %1277 = vmatmul.mubr.msk.f32.vlgmr.msra.gmra.mrb[12].mxu0 %vm43_vm0, %v798_v20 }
0x1084   :  { %1298 = vmatprep.mubr.msk.f32.mxu0 %vm1458_vm1, %v1459_v13  ;;  %1359 = vmatpush3.bf16.msra.mxu0 %v1358_v52 }
0x1085   :  { %1360 = vmatprep.subr.bf16.mxu0 %v1457_v4 }
0x1088   :  { %1362 = vmatpush3.bf16.msra.mxu0 %v1361_v54 }
0x1156   :  { %v867_v22 = vpop.f32.mrb[12].mxu0 }
0x1157   :  { %v871_v23 = vadd.f32 %v867_v22, %v165_v21  ;;  %v1278_v24 = vpop.f32.mrb[13].mxu0 }
0x1159   :  { %1417 = vtanh.f32 %v871_v23  ;;  %v1120_v26 = vmul.f32 -1.442695, %v871_v23 }
0x115b   :  { %1419 = vpow2.f32 %v1120_v26 }
0x1163   :  { %v1418_v25 = vpop.eup %1417 }
0x1164   :  { %881 = vrot.lane.b32.xlu0 %v1418_v25, %s1460_s17 }
0x1165   :  { %v1420_v27 = vpop.eup %1419 }
0x1166   :  { %v875_v28 = vadd.f32 1.0, %v1420_v27 }
0x1168   :  { %1421 = vrcp.f32 %v875_v28 }
0x1172   :  { %v1422_v29 = vpop.eup %1421 }
0x1173   :  { %v879_v13 = vmul.f32 %v1422_v29, %v787_v62 }
0x11d6   :  { %v882_v30 = vpop.permute.xlu0 %881 }
0x11d7   :  { %v884_v31 = vmul.f32 %v1422_v29, %v882_v30 }
0x11d9   :  { %886 = vrot.lane.b32.xlu1 %v884_v31, %s1461_s3 }
0x124b   :  { %v887_v32 = vpop.permute.xlu1 %886 }
0x124c   :  { %v889_v1 = vadd.f32 %v887_v32, %v879_v13 }
0x124e   :  { %1423 = vtanh.f32 %v889_v1 }
0x1258   :  { %v1424_v33 = vpop.eup %1423 }
0x1259   :  { %892 = vrot.lane.b32.xlu0 %v1424_v33, %s1460_s17 }
0x12cb   :  { %v893_v34 = vpop.permute.xlu0 %892 }
0x12cc   :  { %v895_v35 = vmul.f32 %v1422_v29, %v893_v34 }
0x12ce   :  { %899 = vrot.lane.b32.xlu1 %v895_v35, %s1461_s3 }
0x1340   :  { %v900_v36 = vpop.permute.xlu1 %899 }
0x1341   :  { %1288 = vmatmul.mubr.msk.f32.vlgmr.msra.gmra.mrb[8].mxu1 %vm43_vm0, %v900_v36 }
0x1414   :  { %v969_v38 = vpop.f32.mrb[8].mxu1 }
0x1415   :  { %v973_v39 = vadd.f32 %v969_v38, %v170_v37  ;;  %v1289_v40 = vpop.f32.mrb[9].mxu1 }
0x1417   :  { %1425 = vtanh.f32 %v973_v39  ;;  %v1122_v42 = vmul.f32 -1.442695, %v973_v39 }
0x1419   :  { %1427 = vpow2.f32 %v1122_v42 }
0x1421   :  { %v1426_v41 = vpop.eup %1425 }
0x1422   :  { %983 = vrot.lane.b32.xlu0 %v1426_v41, %s1460_s17 }
0x1423   :  { %v1428_v43 = vpop.eup %1427 }
0x1424   :  { %v977_v44 = vadd.f32 1.0, %v1428_v43 }
0x1426   :  { %1429 = vrcp.f32 %v977_v44 }
0x1430   :  { %v1430_v45 = vpop.eup %1429 }
0x1431   :  { %v981_v48 = vmul.f32 %v1430_v45, %v889_v1 }
0x1494   :  { %v984_v46 = vpop.permute.xlu0 %983 }
0x1495   :  { %v986_v47 = vmul.f32 %v1430_v45, %v984_v46 }
0x1497   :  { %988 = vrot.lane.b32.xlu1 %v986_v47, %s1461_s3 }
0x1509   :  { %v989_v49 = vpop.permute.xlu1 %988 }
0x150a   :  { %v991_v16 = vadd.f32 %v989_v49, %v981_v48 }
0x150c   :  { %1431 = vtanh.f32 %v991_v16 }
0x1516   :  { %v1432_v55 = vpop.eup %1431 }
0x1517   :  { %994 = vrot.lane.b32.xlu0 %v1432_v55, %s1460_s17 }
0x1589   :  { %v995_v56 = vpop.permute.xlu0 %994 }
0x158a   :  { %v997_v57 = vmul.f32 %v1430_v45, %v995_v56 }
0x158c   :  { %1010 = vrot.lane.b32.xlu1 %v997_v57, %s1461_s3 }
0x15fe   :  { %v1011_v58 = vpop.permute.xlu1 %1010 }
0x15ff   :  { %1299 = vmatmul.mubr.msk.f32.vlgmr.msra.gmra.mrb[14].mxu0 %vm43_vm0, %v1011_v58 }
0x16d2   :  { %v1080_v60 = vpop.f32.mrb[14].mxu0 }
0x16d3   :  { %v1081_v61 = vadd.f32 %v1123_v59, %v1080_v60  ;;  %v1300_v4 = vpop.f32.mrb[15].mxu0 }
0x16d5   :  { %1084 = vst [vmem:[#allocation3] sm:$0xff] %v1081_v61 }
0x16d6   :  { %1444 = shalt.err (!%p1441_p4)
}
0x16d7   :  { %s1445_s17 = scalar_lea.hbm %s1709_s6, 128 }
0x16d8   :  { %p1446_p5 = scmp.ne.s32.totalorder %s1709_s6, %s1445_s17  ;;  %p1449_p6 = scmp.lt.u32.totalorder %s1445_s17, %s1709_s6 }
0x16da   :  { %p1451_p7 = pnand %p1449_p6, %p1446_p5 }
0x16dc   :  { %1454 = shalt.err (!%p1451_p7)
}
0x16dd   :  { %1094 = dma.vmem_to_hbm [thread:$0]  %s1092_s1, 128, %s1709_s6, [#allocation4]  }
0x16de   :  { %1455 = dma.done.wait [#allocation4], 128  }
0x16df   :  { %1456 = vsyncadd [#allocation4], 4294967168 }
0x16e0   :  { %1098 = vsyncpa [#allocation4], 1 }

</bundles_post_ra>
